<compile_context>
chip_gen: v7x
topology: tpu7x:2x2x1
jax: 0.10.0
libtpu: 0.0.40
codegen_flags: <defaults>
</compile_context>

<pallas_src>
import math
import jax
import jax.numpy as jnp
from jax.experimental import pallas as pl
from jax.experimental.pallas import tpu as pltpu


def _round_up(x, m):
    return (x + m - 1) // m * m


def _linear_kernel(x_ref, wt_ref, b_ref, o_ref):
    # x_ref:  (tile_m, n_hid)   -- streamed row tile (auto double-buffered)
    # wt_ref: (n_hid, n_class)  -- pre-transposed weight, VMEM-resident
    # b_ref:  (1, n_class)      -- bias (f32), VMEM-resident
    # o_ref:  (tile_m, n_class) -- natural output layout
    acc = jnp.dot(x_ref[...], wt_ref[...], preferred_element_type=jnp.float32)
    o_ref[...] = (acc + b_ref[...]).astype(o_ref.dtype)


def _vmem_budget_bytes():
    # Conservative budget that fits every generation's *default* scoped VMEM
    # (v5e 16 MiB, v6e/v7x 32 MiB) without needing vmem_limit_bytes overrides.
    try:
        cap = pltpu.get_tpu_info().vmem_capacity_bytes
    except Exception:
        cap = 64 << 20
    return min(cap // 4, 12 << 20)


def _choose_tile_m(n, n_hid, n_class, itemsize,
                   target_bytes=4 << 20, vmem_budget=None):
    if vmem_budget is None:
        vmem_budget = _vmem_budget_bytes()
    # (a) per-step x block ~target_bytes so DMA time >> per-step fixed cost.
    tile = max(128, (target_bytes // max(1, n_hid * itemsize)) // 128 * 128)
    # (b) VMEM: double-buffered x + double-buffered output must fit the budget
    #     (resident weight/bias are tiny).
    per_row = 2 * n_hid * itemsize + 2 * n_class * 4
    max_rows = max(128, (vmem_budget // per_row) // 128 * 128)
    tile = min(tile, max_rows)
    # (c) keep >=2 grid steps for megacore / v7x dual-TC when N allows it.
    if n > 256:
        tile = min(tile, max(128, _round_up(-(-n // 2), 128)))
    # (d) never larger than the (128-rounded) row count.
    tile = min(tile, _round_up(n, 128))
    return tile


def hgnn_classifier_forward(x, weight, bias, *, tile_m=None,
                            compute_dtype=None, out_dtype=None):
    """Forward of HGNN_classifier.

    x:      [N, n_hid]
    weight: [n_class, n_hid]   (PyTorch nn.Linear layout)
    bias:   [n_class]
    returns [N, n_class]
    """
    n, n_hid = x.shape
    n_class, n_hid_w = weight.shape
    assert n_hid == n_hid_w, "weight/input feature-dim mismatch"

    if out_dtype is None:
        out_dtype = x.dtype
    if compute_dtype is not None:
        # Optional bf16 streaming: halves the dominant x read; f32 accumulate
        # stays on the MXU so it's safe on v5e's bf16-less VPU too.
        x = x.astype(compute_dtype)
    itemsize = jnp.dtype(x.dtype).itemsize

    if tile_m is None:
        tile_m = _choose_tile_m(n, n_hid, n_class, itemsize)
    else:
        tile_m = min(max(128, _round_up(tile_m, 128)), _round_up(n, 128))

    # Tiny one-off layout prep ([n_class, n_hid] only): keeps the MXU on its
    # natural x @ W^T path, no per-tile XLU transpose of the big x tile.
    w_t = weight.astype(x.dtype).T                      # [n_hid, n_class]
    b2d = bias.reshape(1, n_class).astype(jnp.float32)  # [1, n_class]

    grid = (pl.cdiv(n, tile_m),)  # ragged last block clipped by Pallas

    cost = pl.CostEstimate(
        flops=2 * n * n_hid * n_class,
        transcendentals=0,
        bytes_accessed=(n * n_hid + n_hid * n_class) * itemsize
        + n * n_class * jnp.dtype(out_dtype).itemsize
        + n_class * 4,
    )

    return pl.pallas_call(
        _linear_kernel,
        out_shape=jax.ShapeDtypeStruct((n, n_class), out_dtype),
        grid_spec=pltpu.PrefetchScalarGridSpec(
            num_scalar_prefetch=0,
            grid=grid,
            in_specs=[
                # x: one row tile per grid step (pipelined / double-buffered).
                pl.BlockSpec((tile_m, n_hid), lambda i: (i, 0)),
                # weight & bias: constant index_map -> VMEM-resident.
                pl.BlockSpec((n_hid, n_class), lambda i: (0, 0)),
                pl.BlockSpec((1, n_class), lambda i: (0, 0)),
            ],
            out_specs=pl.BlockSpec((tile_m, n_class), lambda i: (i, 0)),
        ),
        compiler_params=pltpu.CompilerParams(
            # Row tiles are independent -> shard across both TCs on v7x.
            dimension_semantics=("parallel",),
        ),
        cost_estimate=cost,
    )(x, w_t, b2d)


def init_params(key, n_hid, n_class):
    # Mirrors nn.Linear default init (uniform(-1/sqrt(fan_in), 1/sqrt(fan_in))).
    kw, kb = jax.random.split(key)
    bound = 1.0 / math.sqrt(n_hid)
    weight = jax.random.uniform(kw, (n_class, n_hid), jnp.float32, -bound, bound)
    bias = jax.random.uniform(kb, (n_class,), jnp.float32, -bound, bound)
    return weight, bias


# TODO(synk): for production, fuse this classifier into the upstream HGNN conv
# kernel so x never round-trips HBM; standalone it is pure bandwidth.

if __name__ == "__main__":
    key = jax.random.PRNGKey(0)
    k_x, k_p = jax.random.split(key)

    n_hid, n_class, batch = 32, 8, 16
    x = jax.random.normal(k_x, (batch, n_hid), jnp.float32)
    weight, bias = init_params(k_p, n_hid, n_class)

    # Small single-step case (block larger than N, writes clipped).
    out = jax.block_until_ready(hgnn_classifier_forward(x, weight, bias))
    ref = x @ weight.T + bias
    assert out.shape == (batch, n_class)
    assert jnp.allclose(out, ref, atol=1e-5, rtol=1e-5)

    # Ragged multi-step grid: auto tile (caps at ~N/2 -> 2 steps) and explicit
    # small tile; exercises boundary-block clipping with no jnp.pad.
    x2 = jax.random.normal(k_x, (300, n_hid), jnp.float32)
    ref2 = x2 @ weight.T + bias
    out2a = jax.block_until_ready(hgnn_classifier_forward(x2, weight, bias))
    out2b = jax.block_until_ready(
        hgnn_classifier_forward(x2, weight, bias, tile_m=128))
    assert out2a.shape == (300, n_class) and out2b.shape == (300, n_class)
    assert jnp.allclose(out2a, ref2, atol=1e-5, rtol=1e-5)
    assert jnp.allclose(out2b, ref2, atol=1e-5, rtol=1e-5)

    print("KERNEL_OK")
</pallas_src>

<mosaic_0001>
module attributes {stable_mosaic.version = 11 : i64} {
  func.func @_linear_kernel(%arg0: i32, %arg1: memref<128x32xf32, #tpu.memory_space<vmem>>, %arg2: memref<32x8xf32, #tpu.memory_space<vmem>>, %arg3: memref<1x8xf32, #tpu.memory_space<vmem>>, %arg4: memref<128x8xf32, #tpu.memory_space<vmem>>) attributes {dimension_semantics = [#tpu.dimension_semantics<parallel>], iteration_bounds = array<i64: 1>, scalar_prefetch = 0 : i64, scratch_operands = 0 : i64, tpu.core_type = #tpu.core_type<tc>, window_params = [{transform_indices = @transform_0, window_bounds = array<i64: 128, 32>}, {pipeline_mode = #tpu.pipeline_mode<synchronous>, transform_indices = @transform_1, window_bounds = array<i64: 32, 8>}, {pipeline_mode = #tpu.pipeline_mode<synchronous>, transform_indices = @transform_2, window_bounds = array<i64: 1, 8>}, {transform_indices = @transform_3, window_bounds = array<i64: 128, 8>}]} {
    %c0 = arith.constant 0 : index
    %c0_0 = arith.constant 0 : index
    %0 = vector.load %arg1[%c0, %c0_0] : memref<128x32xf32, #tpu.memory_space<vmem>>, vector<128x32xf32>
    %c0_1 = arith.constant 0 : index
    %c0_2 = arith.constant 0 : index
    %1 = vector.load %arg2[%c0_1, %c0_2] : memref<32x8xf32, #tpu.memory_space<vmem>>, vector<32x8xf32>
    %cst = arith.constant dense<0.000000e+00> : vector<128x8xf32>
    %2 = tpu.matmul %0, %1, %cst {dimension_numbers = #tpu.dot_dimension_numbers<[1], [0], [0], [1], [0, 0, 1, 1], [], []>} : vector<128x32xf32>, vector<32x8xf32>, vector<128x8xf32> -> vector<128x8xf32>
    %c0_3 = arith.constant 0 : index
    %c0_4 = arith.constant 0 : index
    %3 = vector.load %arg3[%c0_3, %c0_4] : memref<1x8xf32, #tpu.memory_space<vmem>>, vector<1x8xf32>
    %4 = vector.broadcast %3 : vector<1x8xf32> to vector<128x8xf32>
    %5 = arith.addf %2, %4 : vector<128x8xf32>
    %c0_5 = arith.constant 0 : index
    %c0_6 = arith.constant 0 : index
    %6 = vector.load %arg4[%c0_5, %c0_6] : memref<128x8xf32, #tpu.memory_space<vmem>>, vector<128x8xf32>
    tpu.vector_store %arg4[%c0_5, %c0_6], %5 {strides = array<i32>} : memref<128x8xf32, #tpu.memory_space<vmem>>, vector<128x8xf32>,
    return
  }
  func.func @transform_0(%arg0: i32) -> (i32, i32) {
    %c0_i32 = arith.constant 0 : i32
    %c0_i32_0 = arith.constant 0 : i32
    return %arg0, %c0_i32 : i32, i32
  }
  func.func @transform_1(%arg0: i32) -> (i32, i32) {
    %c0_i32 = arith.constant 0 : i32
    %c0_i32_0 = arith.constant 0 : i32
    %c0_i32_1 = arith.constant 0 : i32
    return %c0_i32, %c0_i32_0 : i32, i32
  }
  func.func @transform_2(%arg0: i32) -> (i32, i32) {
    %c0_i32 = arith.constant 0 : i32
    %c0_i32_0 = arith.constant 0 : i32
    %c0_i32_1 = arith.constant 0 : i32
    return %c0_i32, %c0_i32_0 : i32, i32
  }
  func.func @transform_3(%arg0: i32) -> (i32, i32) {
    %c0_i32 = arith.constant 0 : i32
    %c0_i32_0 = arith.constant 0 : i32
    return %arg0, %c0_i32 : i32, i32
  }
}

</mosaic_0001>

<bundles_post_ra>
// kernel: tpu_custom_call.1
= control target key start
LH: loop header
LB: loop body
LE: loop exit
PB: predicated region body
PF: predicated region fallthrough
CT: control target
= control target key end

     0   :  { %vm41_vm0 = vcmask 261120   ;;  %vm235_vm1 = vcmask 64512   ;;  %s482_s0 = inlined_call_operand.vmem [shape: f32[16,32], index: 0, kind: input, shape index: {}]   ;;  %s483_s1 = inlined_call_operand.vmem [shape: f32[32,8], index: 1, kind: input, shape index: {}]   ;;  %s484_s2 = inlined_call_operand.vmem [shape: f32[1,8], index: 2, kind: input, shape index: {}]   ;;  %s485_s3 = inlined_call_operand.vmem [shape: f32[16,8], index: 3, kind: output, shape index: {}]  }
   0x1   :  { %v30_v0 = vld [vmem:[%s483_s1] sm:$0xff]  ;;  %v31_v1 = vld [vmem:[%s483_s1 + $0x8] sm:$0xff]  ;;  %v32_v2 = vld [vmem:[%s483_s1 + $0x10] sm:$0xff] }
   0x2   :  { %v365_v3 = vpack.c.bf16 %v31_v1, %v30_v0  ;;  %v33_v4 = vld [vmem:[%s483_s1 + $0x18] sm:$0xff]  ;;  %v14_v5 = vld [vmem:[%s482_s0] sm:$0xff]  ;;  %v15_v8 = vld [vmem:[%s482_s0 + $0x8] sm:$0xff] }
   0x3   :  { %v22_v6 = vld [vmem:[%s482_s0 + $0x40] sm:$0xff]  ;;  %v369_v7 = vpack.c.bf16 %v33_v4, %v32_v2  ;;  %341 = vmatprep.mubr.msk.f32.mxu0 %vm41_vm0, %v14_v5  ;;  %v23_v9 = vld [vmem:[%s482_s0 + $0x48] sm:$0xff]  ;;  %v16_v10 = vld [vmem:[%s482_s0 + $0x10] sm:$0xff] }
   0x4   :  { %353 = vmatprep.mubr.msk.f32.mxu1 %vm41_vm0, %v22_v6  ;;  %366 = vmatprep.subr.bf16.mxu0 %v365_v3  ;;  %v24_v11 = vld [vmem:[%s482_s0 + $0x50] sm:$0xff]  ;;  %v17_v12 = vld [vmem:[%s482_s0 + $0x18] sm:$0xff]  ;;  %v18_v14 = vld [vmem:[%s482_s0 + $0x20] sm:$0xff] }
   0x5   :  { %373 = vmatprep.subr.bf16.mxu1 %v365_v3  ;;  %368 = vmatpush3.bf16.msra.mxu0 %v365_v3  ;;  %v25_v13 = vld [vmem:[%s482_s0 + $0x58] sm:$0xff]  ;;  %v26_v15 = vld [vmem:[%s482_s0 + $0x60] sm:$0xff]  ;;  %v19_v16 = vld [vmem:[%s482_s0 + $0x28] sm:$0xff] }
   0x6   :  { %375 = vmatpush3.bf16.msra.mxu1 %v365_v3  ;;  %370 = vmatprep.subr.bf16.mxu0 %v369_v7  ;;  %v27_v17 = vld [vmem:[%s482_s0 + $0x68] sm:$0xff]  ;;  %v20_v18 = vld [vmem:[%s482_s0 + $0x30] sm:$0xff]  ;;  %v21_v20 = vld [vmem:[%s482_s0 + $0x38] sm:$0xff] }
   0x7   :  { %374 = vmatprep.subr.bf16.mxu1 %v369_v7  ;;  %v28_v19 = vld [vmem:[%s482_s0 + $0x70] sm:$0xff]  ;;  %v29_v21 = vld [vmem:[%s482_s0 + $0x78] sm:$0xff]  ;;  %v296_v22 = vld [vmem:[%s484_s2] ss:$0 sm:$0xff] }
   0x9   :  { %372 = vmatpush3.bf16.msra.mxu0 %v369_v7 }
   0xa   :  { %376 = vmatpush3.bf16.msra.mxu1 %v369_v7 }
   0xc   :  { %342 = vmatmul.mubr.msk.f32.vlgmr.msra.gmra.mrb[0].mxu0 %vm41_vm0, %v15_v8 }
   0xd   :  { %354 = vmatmul.mubr.msk.f32.vlgmr.msra.gmra.mrb[0].mxu1 %vm41_vm0, %v23_v9  ;;  %344 = vmatprep.mubr.msk.f32.mxu0 %vm41_vm0, %v16_v10 }
   0xe   :  { %356 = vmatprep.mubr.msk.f32.mxu1 %vm41_vm0, %v24_v11 }
  0x10   :  { %345 = vmatmul.mubr.msk.f32.gmra.mrb[2].mxu0 %vm41_vm0, %v17_v12 }
  0x11   :  { %357 = vmatmul.mubr.msk.f32.gmra.mrb[2].mxu1 %vm41_vm0, %v25_v13  ;;  %347 = vmatprep.mubr.msk.f32.mxu0 %vm41_vm0, %v18_v14 }
  0x12   :  { %359 = vmatprep.mubr.msk.f32.mxu1 %vm41_vm0, %v26_v15 }
  0x14   :  { %348 = vmatmul.mubr.msk.f32.gmra.mrb[4].mxu0 %vm41_vm0, %v19_v16 }
  0x15   :  { %360 = vmatmul.mubr.msk.f32.gmra.mrb[4].mxu1 %vm41_vm0, %v27_v17  ;;  %350 = vmatprep.mubr.msk.f32.mxu0 %vm41_vm0, %v20_v18 }
  0x16   :  { %362 = vmatprep.mubr.msk.f32.mxu1 %vm41_vm0, %v28_v19 }
  0x18   :  { %351 = vmatmul.mubr.msk.f32.gmra.mrb[6].mxu0 %vm41_vm0, %v21_v20 }
  0x19   :  { %363 = vmatmul.mubr.msk.f32.gmra.mrb[6].mxu1 %vm41_vm0, %v29_v21 }
  0xdf   :  { %v343_v23 = vpop.f32.mrb[0].mxu0 }
  0xe0   :  { %v355_v24 = vpop.f32.mrb[0].mxu1  ;;  %v162_v25 = vadd.f32 %v343_v23, %v296_v22  ;;  %v156_v26 = vpop.f32.mrb[1].mxu0 }
  0xe1   :  { %v196_v27 = vpop.f32.mrb[1].mxu1  ;;  %v157_v28 = vadd.f32 %v296_v22, %v156_v26 }
  0xe2   :  { %237 = vst.msk [vmem:[#allocation2 + $0x8] sm:$0xff] %vm235_vm1, %v162_v25 }
  0xe3   :  { %236 = vst.msk [vmem:[#allocation2] sm:$0xff] %vm235_vm1, %v157_v28  ;;  %v346_v29 = vpop.f32.mrb[2].mxu0 }
  0xe4   :  { %v358_v30 = vpop.f32.mrb[2].mxu1  ;;  %v166_v31 = vpop.f32.mrb[3].mxu0 }
  0xe5   :  { %v206_v32 = vpop.f32.mrb[3].mxu1 }
  0xe7   :  { %v349_v33 = vpop.f32.mrb[4].mxu0 }
  0xe8   :  { %v361_v34 = vpop.f32.mrb[4].mxu1  ;;  %v176_v35 = vpop.f32.mrb[5].mxu0 }
  0xe9   :  { %v216_v36 = vpop.f32.mrb[5].mxu1  ;;  %v285_v37 = vld [vmem:[#allocation2 + $0x8] sm:$0xff] }
  0xea   :  { %286 = vst [vmem:[%s485_s3 + $0x8] sm:$0xff] %v285_v37  ;;  %v283_v38 = vld [vmem:[#allocation2] sm:$0xff] }
  0xeb   :  { %284 = vst [vmem:[%s485_s3] sm:$0xff] %v283_v38  ;;  %v352_v39 = vpop.f32.mrb[6].mxu0 }
  0xec   :  { %v364_v40 = vpop.f32.mrb[6].mxu1  ;;  %v186_v41 = vpop.f32.mrb[7].mxu0 }
  0xed   :  { %v226_v42 = vpop.f32.mrb[7].mxu1 }

</bundles_post_ra>
